<compile_context>
chip_gen: v7x
topology: tpu7x:2x2x1
jax: 0.10.0
libtpu: 0.0.40
codegen_flags: <defaults>
</compile_context>

<pallas_src>
import jax
import jax.numpy as jnp
from jax.experimental import pallas as pl
from jax.experimental.pallas import tpu as pltpu


def _round_up(a, b):
    return (a + b - 1) // b * b


# ---------------------------------------------------------------------------
# Fused MLP kernel: h = relu(x @ W_l + b_l) for all but the last layer,
#                   out = h @ W_last + b_last.
#   refs = (x_ref, w0, b0, w1, b1, ..., o_ref)
#   x_ref : (TB, K0)     w_l : (K_l, N_l)     b_l : (1, N_l)
#   o_ref : (TB, nf_out)
# All intermediates live in vregs/VMEM; nothing spills to HBM.
# ---------------------------------------------------------------------------
def _make_mlp_kernel(num_layers):
    def kernel(*refs):
        x_ref, o_ref = refs[0], refs[-1]
        wb = refs[1:-1]
        h = x_ref[...]
        for l in range(num_layers):
            w = wb[2 * l][...]
            b = wb[2 * l + 1][...]                  # (1, N_l) broadcasts over rows
            h = jnp.dot(h, w, preferred_element_type=jnp.float32) + b
            if l < num_layers - 1:
                h = jnp.maximum(h, 0.0)             # act='relu'
        o_ref[...] = h.astype(o_ref.dtype)
    return kernel


# ---------------------------------------------------------------------------
# Wrapper. `params` is a flat tuple (w0, b0, w1, b1, ...) with weights stored
# as (in, out), i.e. already transposed relative to nn.Linear's (out, in), so
# y = x @ W + b reproduces the PyTorch forward exactly.
# ---------------------------------------------------------------------------
def mlp_forward(x, params, *, max_batch_tile=256):
    weights = list(params[0::2])
    biases = list(params[1::2])
    num_layers = len(weights)

    B = x.shape[0]
    x2 = x.reshape(B, -1).astype(jnp.float32)        # x.view(x.size(0), -1)
    nf_in = x2.shape[1]
    nf_out = weights[-1].shape[1]

    # Lane-dense contraction for layer 0: pad nf_in up to a multiple of 128
    # with zero columns in x and matching zero rows in W0 (math unchanged).
    K0 = _round_up(nf_in, 128)
    if K0 != nf_in:
        x2 = jnp.pad(x2, ((0, 0), (0, K0 - nf_in)))
        weights[0] = jnp.pad(weights[0].astype(jnp.float32),
                             ((0, K0 - nf_in), (0, 0)))

    # Batch row-tile: multiple of 8 sublanes, as large as practical.
    TB = min(max_batch_tile, _round_up(B, 8))
    Bp = _round_up(B, TB)
    if Bp != B:
        x2 = jnp.pad(x2, ((0, Bp - B), (0, 0)))      # zero rows, sliced off below

    in_specs = [pl.BlockSpec((TB, K0), lambda i: (i, 0))]
    operands = [x2]
    for w, b in zip(weights, biases):
        kin, kout = w.shape
        # Constant index_map -> weights/biases stay VMEM-resident across steps.
        in_specs.append(pl.BlockSpec((kin, kout), lambda i: (0, 0)))
        in_specs.append(pl.BlockSpec((1, kout), lambda i: (0, 0)))
        operands.append(w.astype(jnp.float32))
        operands.append(b.reshape(1, -1).astype(jnp.float32))

    out = pl.pallas_call(
        _make_mlp_kernel(num_layers),
        out_shape=jax.ShapeDtypeStruct((Bp, nf_out), jnp.float32),
        grid_spec=pltpu.PrefetchScalarGridSpec(
            num_scalar_prefetch=0,
            grid=(Bp // TB,),
            in_specs=in_specs,
            out_specs=pl.BlockSpec((TB, nf_out), lambda i: (i, 0))),
        compiler_params=pltpu.CompilerParams(
            dimension_semantics=("parallel",)),      # batch splits across TCs (v7x)
    )(*operands)

    return out[:B]


# ---------------------------------------------------------------------------
# Pure-JAX reference (semantics of the PyTorch MLP.forward) for verification.
# ---------------------------------------------------------------------------
def mlp_reference(x, params):
    weights = params[0::2]
    biases = params[1::2]
    n = len(weights)
    h = x.reshape(x.shape[0], -1).astype(jnp.float32)
    for l, (w, b) in enumerate(zip(weights, biases)):
        h = h @ w + b.reshape(1, -1)
        if l < n - 1:
            h = jnp.maximum(h, 0.0)
    return h


if __name__ == "__main__":
    # Small, TPU-friendly config: nf_in=64 (x of shape (B,4,4,4) flattened),
    # nf_mlp=128, nf_out=256 (lane-dense), num_blocks=3, batch=8.
    B = 8
    nf_in, nf_mlp, nf_out, num_blocks = 64, 128, 256, 3

    key = jax.random.PRNGKey(0)
    keys = jax.random.split(key, 2 * num_blocks + 1)
    x = jax.random.normal(keys[0], (B, 4, 4, 4), jnp.float32)   # view -> (B, 64)

    dims = [nf_in] + [nf_mlp] * (num_blocks - 1) + [nf_out]
    params = []
    for l in range(num_blocks):
        kin, kout = dims[l], dims[l + 1]
        w = 0.1 * jax.random.normal(keys[1 + 2 * l], (kin, kout), jnp.float32)
        b = 0.1 * jax.random.normal(keys[2 + 2 * l], (1, kout), jnp.float32)
        params += [w, b]
    params = tuple(params)

    out = jax.block_until_ready(mlp_forward(x, params))
    ref = mlp_reference(x, params)

    assert out.shape == (B, nf_out), out.shape
    assert jnp.allclose(out, ref, atol=1e-4, rtol=1e-4), \
        float(jnp.max(jnp.abs(out - ref)))

    print("KERNEL_OK")
</pallas_src>

<mosaic_0001>
module attributes {stable_mosaic.version = 11 : i64} {
  func.func @kernel(%arg0: i32, %arg1: memref<8x128xf32, #tpu.memory_space<vmem>>, %arg2: memref<128x128xf32, #tpu.memory_space<vmem>>, %arg3: memref<1x128xf32, #tpu.memory_space<vmem>>, %arg4: memref<128x128xf32, #tpu.memory_space<vmem>>, %arg5: memref<1x128xf32, #tpu.memory_space<vmem>>, %arg6: memref<128x256xf32, #tpu.memory_space<vmem>>, %arg7: memref<1x256xf32, #tpu.memory_space<vmem>>, %arg8: memref<8x256xf32, #tpu.memory_space<vmem>>) attributes {dimension_semantics = [#tpu.dimension_semantics<parallel>], iteration_bounds = array<i64: 1>, scalar_prefetch = 0 : i64, scratch_operands = 0 : i64, tpu.core_type = #tpu.core_type<tc>, window_params = [{transform_indices = @transform_0, window_bounds = array<i64: 8, 128>}, {pipeline_mode = #tpu.pipeline_mode<synchronous>, transform_indices = @transform_1, window_bounds = array<i64: 128, 128>}, {pipeline_mode = #tpu.pipeline_mode<synchronous>, transform_indices = @transform_2, window_bounds = array<i64: 1, 128>}, {pipeline_mode = #tpu.pipeline_mode<synchronous>, transform_indices = @transform_3, window_bounds = array<i64: 128, 128>}, {pipeline_mode = #tpu.pipeline_mode<synchronous>, transform_indices = @transform_4, window_bounds = array<i64: 1, 128>}, {pipeline_mode = #tpu.pipeline_mode<synchronous>, transform_indices = @transform_5, window_bounds = array<i64: 128, 256>}, {pipeline_mode = #tpu.pipeline_mode<synchronous>, transform_indices = @transform_6, window_bounds = array<i64: 1, 256>}, {transform_indices = @transform_7, window_bounds = array<i64: 8, 256>}]} {
    %c0 = arith.constant 0 : index
    %c0_0 = arith.constant 0 : index
    %0 = vector.load %arg1[%c0, %c0_0] : memref<8x128xf32, #tpu.memory_space<vmem>>, vector<8x128xf32>
    %c0_1 = arith.constant 0 : index
    %c0_2 = arith.constant 0 : index
    %1 = vector.load %arg2[%c0_1, %c0_2] : memref<128x128xf32, #tpu.memory_space<vmem>>, vector<128x128xf32>
    %c0_3 = arith.constant 0 : index
    %c0_4 = arith.constant 0 : index
    %2 = vector.load %arg3[%c0_3, %c0_4] : memref<1x128xf32, #tpu.memory_space<vmem>>, vector<1x128xf32>
    %cst = arith.constant dense<0.000000e+00> : vector<8x128xf32>
    %3 = tpu.matmul %0, %1, %cst {dimension_numbers = #tpu.dot_dimension_numbers<[1], [0], [0], [1], [0, 0, 1, 1], [], []>} : vector<8x128xf32>, vector<128x128xf32>, vector<8x128xf32> -> vector<8x128xf32>
    %4 = vector.broadcast %2 : vector<1x128xf32> to vector<8x128xf32>
    %5 = arith.addf %3, %4 : vector<8x128xf32>
    %cst_5 = arith.constant 0.000000e+00 : f32
    %6 = vector.broadcast %cst_5 : f32 to vector<8x128xf32>
    %7 = arith.maximumf %5, %6 : vector<8x128xf32>
    %c0_6 = arith.constant 0 : index
    %c0_7 = arith.constant 0 : index
    %8 = vector.load %arg4[%c0_6, %c0_7] : memref<128x128xf32, #tpu.memory_space<vmem>>, vector<128x128xf32>
    %c0_8 = arith.constant 0 : index
    %c0_9 = arith.constant 0 : index
    %9 = vector.load %arg5[%c0_8, %c0_9] : memref<1x128xf32, #tpu.memory_space<vmem>>, vector<1x128xf32>
    %cst_10 = arith.constant dense<0.000000e+00> : vector<8x128xf32>
    %10 = tpu.matmul %7, %8, %cst_10 {dimension_numbers = #tpu.dot_dimension_numbers<[1], [0], [0], [1], [0, 0, 1, 1], [], []>} : vector<8x128xf32>, vector<128x128xf32>, vector<8x128xf32> -> vector<8x128xf32>
    %11 = vector.broadcast %9 : vector<1x128xf32> to vector<8x128xf32>
    %12 = arith.addf %10, %11 : vector<8x128xf32>
    %cst_11 = arith.constant 0.000000e+00 : f32
    %13 = vector.broadcast %cst_11 : f32 to vector<8x128xf32>
    %14 = arith.maximumf %12, %13 : vector<8x128xf32>
    %c0_12 = arith.constant 0 : index
    %c0_13 = arith.constant 0 : index
    %15 = vector.load %arg6[%c0_12, %c0_13] : memref<128x256xf32, #tpu.memory_space<vmem>>, vector<128x256xf32>
    %c0_14 = arith.constant 0 : index
    %c0_15 = arith.constant 0 : index
    %16 = vector.load %arg7[%c0_14, %c0_15] : memref<1x256xf32, #tpu.memory_space<vmem>>, vector<1x256xf32>
    %cst_16 = arith.constant dense<0.000000e+00> : vector<8x256xf32>
    %17 = tpu.matmul %14, %15, %cst_16 {dimension_numbers = #tpu.dot_dimension_numbers<[1], [0], [0], [1], [0, 0, 1, 1], [], []>} : vector<8x128xf32>, vector<128x256xf32>, vector<8x256xf32> -> vector<8x256xf32>
    %18 = vector.broadcast %16 : vector<1x256xf32> to vector<8x256xf32>
    %19 = arith.addf %17, %18 : vector<8x256xf32>
    %c0_17 = arith.constant 0 : index
    %c0_18 = arith.constant 0 : index
    %20 = vector.load %arg8[%c0_17, %c0_18] : memref<8x256xf32, #tpu.memory_space<vmem>>, vector<8x256xf32>
    tpu.vector_store %arg8[%c0_17, %c0_18], %19 {strides = array<i32>} : memref<8x256xf32, #tpu.memory_space<vmem>>, vector<8x256xf32>,
    return
  }
  func.func @transform_0(%arg0: i32) -> (i32, i32) {
    %c0_i32 = arith.constant 0 : i32
    %c0_i32_0 = arith.constant 0 : i32
    return %arg0, %c0_i32 : i32, i32
  }
  func.func @transform_1(%arg0: i32) -> (i32, i32) {
    %c0_i32 = arith.constant 0 : i32
    %c0_i32_0 = arith.constant 0 : i32
    %c0_i32_1 = arith.constant 0 : i32
    return %c0_i32, %c0_i32_0 : i32, i32
  }
  func.func @transform_2(%arg0: i32) -> (i32, i32) {
    %c0_i32 = arith.constant 0 : i32
    %c0_i32_0 = arith.constant 0 : i32
    %c0_i32_1 = arith.constant 0 : i32
    return %c0_i32, %c0_i32_0 : i32, i32
  }
  func.func @transform_3(%arg0: i32) -> (i32, i32) {
    %c0_i32 = arith.constant 0 : i32
    %c0_i32_0 = arith.constant 0 : i32
    %c0_i32_1 = arith.constant 0 : i32
    return %c0_i32, %c0_i32_0 : i32, i32
  }
  func.func @transform_4(%arg0: i32) -> (i32, i32) {
    %c0_i32 = arith.constant 0 : i32
    %c0_i32_0 = arith.constant 0 : i32
    %c0_i32_1 = arith.constant 0 : i32
    return %c0_i32, %c0_i32_0 : i32, i32
  }
  func.func @transform_5(%arg0: i32) -> (i32, i32) {
    %c0_i32 = arith.constant 0 : i32
    %c0_i32_0 = arith.constant 0 : i32
    %c0_i32_1 = arith.constant 0 : i32
    return %c0_i32, %c0_i32_0 : i32, i32
  }
  func.func @transform_6(%arg0: i32) -> (i32, i32) {
    %c0_i32 = arith.constant 0 : i32
    %c0_i32_0 = arith.constant 0 : i32
    %c0_i32_1 = arith.constant 0 : i32
    return %c0_i32, %c0_i32_0 : i32, i32
  }
  func.func @transform_7(%arg0: i32) -> (i32, i32) {
    %c0_i32 = arith.constant 0 : i32
    %c0_i32_0 = arith.constant 0 : i32
    return %arg0, %c0_i32 : i32, i32
  }
}

</mosaic_0001>

<bundles_post_ra>
// kernel: tpu_custom_call.1
= control target key start
LH: loop header
LB: loop body
LE: loop exit
PB: predicated region body
PF: predicated region fallthrough
CT: control target
= control target key end

     0   :  { %12 = vsyncpa [#allocation3], 0  ;;  %s865_s0 = inlined_call_operand.hbm [shape: f32[8,128], index: 0, kind: input, shape index: {}]   ;;  %s866_s1 = inlined_call_operand.hbm [shape: f32[128,128], index: 1, kind: input, shape index: {}]   ;;  %s867_s2 = inlined_call_operand.vmem [shape: f32[1,128], index: 2, kind: input, shape index: {}]   ;;  %s868_s3 = inlined_call_operand.hbm [shape: f32[128,128], index: 3, kind: input, shape index: {}]   ;;  %s869_s4 = inlined_call_operand.vmem [shape: f32[1,128], index: 4, kind: input, shape index: {}]   ;;  %s870_s5 = inlined_call_operand.hbm [shape: f32[128,256], index: 5, kind: input, shape index: {}]   ;;  %s871_s6 = inlined_call_operand.vmem [shape: f32[1,256], index: 6, kind: input, shape index: {}]   ;;  %s872_s7 = inlined_call_operand.hbm [shape: f32[8,256], index: 7, kind: output, shape index: {}]  }
   0x1   :  { %13 = vsyncpa [#allocation6], 0 }
   0x2   :  { %14 = vsyncpa [#allocation9], 0 }
   0x3   :  { %15 = vsyncpa [#allocation4], 0  ;;  %s719_s24 = smov [#allocation5]   ;;  %s601_s28 = scalar_lea.hbm %s866_s1, 2048 }
   0x4   :  { %s31_s25 = sshll.u32 %s719_s24, 4  ;;  %p602_p0 = scmp.ne.s32.totalorder %s866_s1, %s601_s28  ;;  %s32_s25 = int_to_ptr.vmem [resolvable:$true] %s31_s25 }
   0x5   :  { %p605_p1 = scmp.lt.u32.totalorder %s601_s28, %s866_s1 }
   0x7   :  { %p607_p2 = pnand %p605_p1, %p602_p0 }
   0x9   :  { %610 = shalt.err (!%p607_p2)
}
   0xa   :  { %s611_s10 = scalar_lea.vmem %s32_s25, 2048  ;;  %p616_p4 = scmp.lt.s32.totalorder %s32_s25, %s32_s25 }
   0xb   :  { %p612_p3 = scmp.ne.s32.totalorder %s32_s25, %s611_s10  ;;  %p617_p5 = scmp.lt.s32.totalorder %s611_s10, %s611_s10 }
   0xd   :  { %p618_p6 = por %p617_p5, %p616_p4 }
   0xf   :  { %p619_p7 = pnand %p618_p6, %p612_p3 }
  0x11   :  { %622 = shalt.err (!%p619_p7)
}
  0x12   :  { %s720_s11 = smov 128   ;;  %s721_s12 = smov 8  }
  0x13   :  { %37 = dma.hbm_to_vmem [thread:$0]  %s866_s1, 2048, %s32_s25, [#allocation6], %s720_s11, %s720_s11, %s721_s12  }
  0x14   :  { %s722_s15 = smov [#allocation2]   ;;  %s723_s17 = smov [#allocation7]  }
  0x15   :  { %s22_s16 = sshll.u32 %s722_s15, 4  ;;  %s45_s18 = sshll.u32 %s723_s17, 4  ;;  %s23_s16 = int_to_ptr.vmem [resolvable:$true] %s22_s16  ;;  %s46_s18 = int_to_ptr.vmem [resolvable:$true] %s45_s18 }
  0x16   :  { %s623_s21 = scalar_lea.hbm %s865_s0, 128 }
  0x17   :  { %p624_p8 = scmp.ne.s32.totalorder %s865_s0, %s623_s21  ;;  %p627_p9 = scmp.lt.u32.totalorder %s623_s21, %s865_s0 }
  0x19   :  { %p629_p10 = pnand %p627_p9, %p624_p8 }
  0x1b   :  { %632 = shalt.err (!%p629_p10)
}
  0x1c   :  { %s633_s1 = scalar_lea.vmem %s23_s16, 128  ;;  %p638_p12 = scmp.lt.s32.totalorder %s23_s16, %s23_s16 }
  0x1d   :  { %p634_p11 = scmp.ne.s32.totalorder %s23_s16, %s633_s1  ;;  %p639_p13 = scmp.lt.s32.totalorder %s633_s1, %s633_s1 }
  0x1f   :  { %p640_p0 = por %p639_p13, %p638_p12 }
  0x21   :  { %p641_p1 = pnand %p640_p0, %p634_p11 }
  0x23   :  { %644 = shalt.err (!%p641_p1)
}
  0x24   :  { %25 = dma.hbm_to_vmem [thread:$0]  %s865_s0, 128, %s23_s16, [#allocation3]  }
  0x25   :  { %s645_s30 = scalar_lea.hbm %s868_s3, 2048 }
  0x26   :  { %p646_p2 = scmp.ne.s32.totalorder %s868_s3, %s645_s30  ;;  %p649_p3 = scmp.lt.u32.totalorder %s645_s30, %s868_s3 }
  0x28   :  { %p651_p4 = pnand %p649_p3, %p646_p2 }
  0x2a   :  { %654 = shalt.err (!%p651_p4)
}
  0x2b   :  { %s655_s14 = scalar_lea.vmem %s46_s18, 2048  ;;  %p660_p6 = scmp.lt.s32.totalorder %s46_s18, %s46_s18 }
  0x2c   :  { %p656_p5 = scmp.ne.s32.totalorder %s46_s18, %s655_s14  ;;  %p661_p7 = scmp.lt.s32.totalorder %s655_s14, %s655_s14 }
  0x2e   :  { %p662_p8 = por %p661_p7, %p660_p6 }
  0x30   :  { %p663_p9 = pnand %p662_p8, %p656_p5 }
  0x32   :  { %666 = shalt.err (!%p663_p9)
}
  0x33   :  { %51 = dma.hbm_to_vmem [thread:$0]  %s868_s3, 2048, %s46_s18, [#allocation6], %s720_s11, %s720_s11, %s721_s12  }
  0x34   :  { %s724_s16 = smov [#allocation8]   ;;  %s667_s21 = scalar_lea.hbm %s870_s5, 4096 }
  0x35   :  { %s59_s17 = sshll.u32 %s724_s16, 4  ;;  %p668_p10 = scmp.ne.s32.totalorder %s870_s5, %s667_s21  ;;  %s60_s17 = int_to_ptr.vmem [resolvable:$true] %s59_s17 }
  0x36   :  { %p671_p11 = scmp.lt.u32.totalorder %s667_s21, %s870_s5 }
  0x38   :  { %p673_p12 = pnand %p671_p11, %p668_p10 }
  0x3a   :  { %676 = shalt.err (!%p673_p12)
}
  0x3b   :  { %s677_s1 = scalar_lea.vmem %s60_s17, 4096  ;;  %p682_p0 = scmp.lt.s32.totalorder %s60_s17, %s60_s17 }
  0x3c   :  { %p678_p13 = scmp.ne.s32.totalorder %s60_s17, %s677_s1  ;;  %p683_p1 = scmp.lt.s32.totalorder %s677_s1, %s677_s1 }
  0x3e   :  { %p684_p2 = por %p683_p1, %p682_p0 }
  0x40   :  { %p685_p3 = pnand %p684_p2, %p678_p13 }
  0x42   :  { %688 = shalt.err (!%p685_p3)
}
  0x43   :  { %s725_s3 = smov 256   ;;  %s726_s11 = smov 16  }
  0x44   :  { %65 = dma.hbm_to_vmem [thread:$0]  %s870_s5, 4096, %s60_s17, [#allocation9], %s725_s3, %s725_s3, %s726_s11  }
  0x45   :  { %711 = dma.done.wait [#allocation3], 128  }
  0x46   :  { %712 = vsyncadd [#allocation3], 4294967168 }
  0x47   :  { %713 = dma.done.wait [#allocation6], 4096  }
  0x48   :  { %714 = vsyncadd [#allocation6], 4294963200 }
  0x49   :  { %715 = dma.done.wait [#allocation9], 4096  }
  0x4a   :  { %716 = vsyncadd [#allocation9], 4294963200  ;;  %v727_v0 = vmov 0.0|0.0   ;;  %vm728_vm0 = vmmov 0   ;;  %v729_v1 = vmov 0.0   ;;  %v81_v2 = vld [vmem:[#allocation5] sm:$0xff] }
  0x4b   :  { %509 = vmatprep.subr.bf16.mxu0 %v727_v0  ;;  %471 = vmatprep.mubr.msk.f32.mxu0 %vm728_vm0, %v729_v1  ;;  %v82_v3 = vld [vmem:[#allocation5 + $0x8] sm:$0xff]  ;;  %v83_v4 = vld [vmem:[#allocation5 + $0x10] sm:$0xff]  ;;  %v84_v6 = vld [vmem:[#allocation5 + $0x18] sm:$0xff]  ;;  %s730_s30 = smov [#allocation10]  }
  0x4c   :  { %533 = vmatprep.subr.bf16.mxu1 %v727_v0  ;;  %506 = vmatprep.mubr.msk.f32.mxu1 %vm728_vm0, %v729_v1  ;;  %v510_v5 = vpack.c.bf16 %v82_v3, %v81_v2  ;;  %v513_v7 = vpack.c.bf16 %v84_v6, %v83_v4  ;;  %v85_v8 = vld [vmem:[#allocation5 + $0x20] sm:$0xff]  ;;  %v86_v9 = vld [vmem:[#allocation5 + $0x28] sm:$0xff]  ;;  %v177_v12 = vld [vmem:[#allocation7 + $0x10] sm:$0xff]  ;;  %s392_s8 = sshll.u32 %s730_s30, 4  ;;  %s393_s8 = int_to_ptr.vmem [resolvable:$true] %s392_s8 }
  0x4d   :  { %v175_v10 = vld [vmem:[#allocation7] sm:$0xff]  ;;  %v176_v11 = vld [vmem:[#allocation7 + $0x8] sm:$0xff]  ;;  %v178_v13 = vld [vmem:[#allocation7 + $0x18] sm:$0xff]  ;;  %v516_v14 = vpack.c.bf16 %v86_v9, %v85_v8  ;;  %p694_p5 = scmp.lt.s32.totalorder %s393_s8, %s393_s8 }
  0x4e   :  { %511 = vmatpush3.bf16.msra.mxu0 %v510_v5  ;;  %v534_v15 = vpack.c.bf16 %v176_v11, %v175_v10  ;;  %v87_v16 = vld [vmem:[#allocation5 + $0x30] sm:$0xff]  ;;  %v88_v17 = vld [vmem:[#allocation5 + $0x38] sm:$0xff]  ;;  %v537_v18 = vpack.c.bf16 %v178_v13, %v177_v12  ;;  %v179_v19 = vld [vmem:[#allocation7 + $0x20] sm:$0xff] }
  0x4f   :  { %512 = vmatprep.subr.bf16.mxu0 %v727_v0  ;;  %v180_v20 = vld [vmem:[#allocation7 + $0x28] sm:$0xff]  ;;  %v519_v21 = vpack.c.bf16 %v88_v17, %v87_v16  ;;  %v89_v22 = vld [vmem:[#allocation5 + $0x40] sm:$0xff]  ;;  %v181_v25 = vld [vmem:[#allocation7 + $0x30] sm:$0xff] }
  0x50   :  { %535 = vmatpush3.bf16.msra.mxu1 %v534_v15  ;;  %v90_v23 = vld [vmem:[#allocation5 + $0x48] sm:$0xff]  ;;  %v540_v24 = vpack.c.bf16 %v180_v20, %v179_v19  ;;  %v182_v26 = vld [vmem:[#allocation7 + $0x38] sm:$0xff]  ;;  %v91_v28 = vld [vmem:[#allocation5 + $0x50] sm:$0xff] }
  0x51   :  { %536 = vmatprep.subr.bf16.mxu1 %v727_v0  ;;  %v522_v27 = vpack.c.bf16 %v90_v23, %v89_v22  ;;  %v92_v29 = vld [vmem:[#allocation5 + $0x58] sm:$0xff]  ;;  %v543_v30 = vpack.c.bf16 %v182_v26, %v181_v25  ;;  %v183_v31 = vld [vmem:[#allocation7 + $0x40] sm:$0xff]  ;;  %v184_v32 = vld [vmem:[#allocation7 + $0x48] sm:$0xff] }
  0x52   :  { %514 = vmatpush3.bf16.msra.mxu0 %v513_v7  ;;  %v525_v33 = vpack.c.bf16 %v92_v29, %v91_v28  ;;  %v93_v34 = vld [vmem:[#allocation5 + $0x60] sm:$0xff]  ;;  %v94_v35 = vld [vmem:[#allocation5 + $0x68] sm:$0xff]  ;;  %v546_v36 = vpack.c.bf16 %v184_v32, %v183_v31  ;;  %v185_v37 = vld [vmem:[#allocation7 + $0x50] sm:$0xff] }
  0x53   :  { %515 = vmatprep.subr.bf16.mxu0 %v727_v0  ;;  %v186_v38 = vld [vmem:[#allocation7 + $0x58] sm:$0xff]  ;;  %v528_v39 = vpack.c.bf16 %v94_v35, %v93_v34  ;;  %v95_v40 = vld [vmem:[#allocation5 + $0x70] sm:$0xff]  ;;  %v187_v43 = vld [vmem:[#allocation7 + $0x60] sm:$0xff] }
  0x54   :  { %538 = vmatpush3.bf16.msra.mxu1 %v537_v18  ;;  %v96_v41 = vld [vmem:[#allocation5 + $0x78] sm:$0xff]  ;;  %v549_v42 = vpack.c.bf16 %v186_v38, %v185_v37  ;;  %v188_v44 = vld [vmem:[#allocation7 + $0x68] sm:$0xff]  ;;  %v189_v48 = vld [vmem:[#allocation7 + $0x70] sm:$0xff] }
  0x55   :  { %539 = vmatprep.subr.bf16.mxu1 %v727_v0  ;;  %v531_v45 = vpack.c.bf16 %v96_v41, %v95_v40  ;;  %v552_v46 = vpack.c.bf16 %v188_v44, %v187_v43  ;;  %v80_v47 = vld [vmem:[#allocation2] sm:$0xff]  ;;  %v270_v51 = vld [vmem:[#allocation8 + $0x8] sm:$0xff]  ;;  %v269_v53 = vld [vmem:[#allocation8] sm:$0xff] }
  0x56   :  { %517 = vmatpush3.bf16.msra.mxu0 %v516_v14  ;;  %v190_v49 = vld [vmem:[#allocation7 + $0x78] sm:$0xff]  ;;  %v271_v55 = vld [vmem:[#allocation8 + $0x10] sm:$0xff]  ;;  %v274_v56 = vld [vmem:[#allocation8 + $0x28] sm:$0xff] }
  0x57   :  { %518 = vmatprep.subr.bf16.mxu0 %v727_v0  ;;  %v555_v50 = vpack.c.bf16 %v190_v49, %v189_v48  ;;  %v272_v52 = vld [vmem:[#allocation8 + $0x18] sm:$0xff]  ;;  %v559_v58 = vpack.c.bf16 %v271_v55, %v269_v53  ;;  %v273_v60 = vld [vmem:[#allocation8 + $0x20] sm:$0xff]  ;;  %v275_v61 = vld [vmem:[#allocation8 + $0x30] sm:$0xff] }
  0x58   :  { %541 = vmatpush3.bf16.msra.mxu1 %v540_v24  ;;  %v557_v54 = vpack.c.bf16 %v272_v52, %v270_v51  ;;  %v276_v57 = vld [vmem:[#allocation8 + $0x38] sm:$0xff]  ;;  %v278_v62 = vld [vmem:[#allocation8 + $0x48] sm:$0xff]  ;;  %v277_v2 = vld [vmem:[#allocation8 + $0x40] sm:$0xff] }
  0x59   :  { %542 = vmatprep.subr.bf16.mxu1 %v727_v0  ;;  %v561_v59 = vpack.c.bf16 %v276_v57, %v274_v56  ;;  %v280_v63 = vld [vmem:[#allocation8 + $0x58] sm:$0xff]  ;;  %v279_v3 = vld [vmem:[#allocation8 + $0x50] sm:$0xff]  ;;  %v282_v4 = vld [vmem:[#allocation8 + $0x68] sm:$0xff] }
  0x5a   :  { %520 = vmatpush3.bf16.msra.mxu0 %v519_v21  ;;  %v284_v5 = vld [vmem:[#allocation8 + $0x78] sm:$0xff]  ;;  %v567_v6 = vpack.c.bf16 %v279_v3, %v277_v2  ;;  %v281_v8 = vld [vmem:[#allocation8 + $0x60] sm:$0xff]  ;;  %v283_v9 = vld [vmem:[#allocation8 + $0x70] sm:$0xff] }
  0x5b   :  { %521 = vmatprep.subr.bf16.mxu0 %v727_v0  ;;  %v569_v7 = vpack.c.bf16 %v284_v5, %v282_v4  ;;  %v286_v10 = vld [vmem:[#allocation8 + $0x88] sm:$0xff]  ;;  %v288_v11 = vld [vmem:[#allocation8 + $0x98] sm:$0xff]  ;;  %v571_v12 = vpack.c.bf16 %v283_v9, %v281_v8  ;;  %v285_v14 = vld [vmem:[#allocation8 + $0x80] sm:$0xff] }
  0x5c   :  { %544 = vmatpush3.bf16.msra.mxu1 %v543_v30  ;;  %v573_v13 = vpack.c.bf16 %v288_v11, %v286_v10  ;;  %v287_v15 = vld [vmem:[#allocation8 + $0x90] sm:$0xff]  ;;  %v290_v16 = vld [vmem:[#allocation8 + $0xa8] sm:$0xff]  ;;  %v292_v17 = vld [vmem:[#allocation8 + $0xb8] sm:$0xff] }
  0x5d   :  { %545 = vmatprep.subr.bf16.mxu1 %v727_v0  ;;  %v575_v18 = vpack.c.bf16 %v287_v15, %v285_v14  ;;  %v577_v19 = vpack.c.bf16 %v292_v17, %v290_v16  ;;  %v289_v20 = vld [vmem:[#allocation8 + $0xa0] sm:$0xff]  ;;  %v291_v21 = vld [vmem:[#allocation8 + $0xb0] sm:$0xff]  ;;  %v294_v22 = vld [vmem:[#allocation8 + $0xc8] sm:$0xff] }
  0x5e   :  { %523 = vmatpush3.bf16.msra.mxu0 %v522_v27  ;;  %v296_v23 = vld [vmem:[#allocation8 + $0xd8] sm:$0xff]  ;;  %v579_v24 = vpack.c.bf16 %v291_v21, %v289_v20  ;;  %v293_v26 = vld [vmem:[#allocation8 + $0xc0] sm:$0xff]  ;;  %v295_v27 = vld [vmem:[#allocation8 + $0xd0] sm:$0xff] }
  0x5f   :  { %524 = vmatprep.subr.bf16.mxu0 %v727_v0  ;;  %v581_v25 = vpack.c.bf16 %v296_v23, %v294_v22  ;;  %v583_v28 = vpack.c.bf16 %v295_v27, %v293_v26  ;;  %v403_v29 = vld [vmem:[%s867_s2] ss:$0 sm:$0xff]  ;;  %v298_v34 = vld [vmem:[#allocation8 + $0xe8] sm:$0xff]  ;;  %v297_v37 = vld [vmem:[#allocation8 + $0xe0] sm:$0xff] }
  0x60   :  { %547 = vmatpush3.bf16.msra.mxu1 %v546_v36  ;;  %v300_v35 = vld [vmem:[#allocation8 + $0xf8] sm:$0xff]  ;;  %v299_v38 = vld [vmem:[#allocation8 + $0xf0] sm:$0xff] }
  0x61   :  { %548 = vmatprep.subr.bf16.mxu1 %v727_v0  ;;  %v585_v36 = vpack.c.bf16 %v300_v35, %v298_v34  ;;  %v404_v40 = vld [vmem:[%s869_s4] ss:$0 sm:$0xff]  ;;  %s689_s4 = scalar_lea.vmem %s393_s8, 256 }
  0x62   :  { %526 = vmatpush3.bf16.msra.mxu0 %v525_v33  ;;  %v301_v48 = vld [vmem:[%s871_s6] sm:$0x3]  ;;  %p690_p4 = scmp.ne.s32.totalorder %s393_s8, %s689_s4  ;;  %p695_p6 = scmp.lt.s32.totalorder %s689_s4, %s689_s4 }
  0x63   :  { %527 = vmatprep.subr.bf16.mxu0 %v727_v0 }
  0x64   :  { %550 = vmatpush3.bf16.msra.mxu1 %v549_v42  ;;  %p696_p7 = por %p695_p6, %p694_p5 }
  0x65   :  { %551 = vmatprep.subr.bf16.mxu1 %v727_v0 }
  0x66   :  { %529 = vmatpush3.bf16.msra.mxu0 %v528_v39  ;;  %v587_v39 = vpack.c.bf16 %v299_v38, %v297_v37  ;;  %p697_p8 = pnand %p696_p7, %p690_p4 }
  0x67   :  { %530 = vmatprep.subr.bf16.mxu0 %v727_v0 }
  0x68   :  { %553 = vmatpush3.bf16.msra.mxu1 %v552_v46 }
  0x69   :  { %554 = vmatprep.subr.bf16.mxu1 %v727_v0  ;;  %v563_v0 = vpack.c.bf16 %v275_v61, %v273_v60 }
  0x6a   :  { %532 = vmatpush3.bf16.msra.mxu0 %v531_v45  ;;  %v303_v45 = vlaneseq }
  0x6b   :  { %558 = vmatprep.subr.bf16.mxu0 %v557_v54 }
  0x6c   :  { %556 = vmatpush3.bf16.msra.mxu1 %v555_v50  ;;  %v304_v46 = vshrl.u32 %v303_v45, 7 }
  0x6d   :  { %472 = vmatmul.mubr.f32.vlgmr.msra.gmra.mrb[0].mxu0 %v80_v47 }
  0x6e   :  { %377 = vmatprep.mubr.f32.mxu0 %v729_v1  ;;  %560 = vmatpush1.bf16.msra.mxu0 %v559_v58  ;;  %v565_v1 = vpack.c.bf16 %v280_v63, %v278_v62  ;;  %v305_v47 = vsub.s32 0, %v304_v46  ;;  %v309_v49 = vsub.s32 1, %v304_v46 }
  0x6f   :  { %562 = vmatprep.subr.bf16.mxu0 %v561_v59 }
  0x70   :  { %v306_v50 = vrot.slane %v301_v48, %v305_v47  ;;  %v310_v51 = vrot.slane %v301_v48, %v309_v49 }
  0x72   :  { %564 = vmatpush1.bf16.msra.mxu0 %v563_v0 }
  0x73   :  { %566 = vmatprep.subr.bf16.mxu0 %v565_v1 }
  0x76   :  { %568 = vmatpush1.bf16.msra.mxu0 %v567_v6 }
  0x77   :  { %570 = vmatprep.subr.bf16.mxu0 %v569_v7 }
  0x7a   :  { %572 = vmatpush1.bf16.msra.mxu0 %v571_v12 }
  0x7b   :  { %574 = vmatprep.subr.bf16.mxu0 %v573_v13 }
  0x7e   :  { %576 = vmatpush1.bf16.msra.mxu0 %v575_v18 }
  0x7f   :  { %578 = vmatprep.subr.bf16.mxu0 %v577_v19 }
  0x82   :  { %580 = vmatpush1.bf16.msra.mxu0 %v579_v24 }
  0x83   :  { %582 = vmatprep.subr.bf16.mxu0 %v581_v25 }
  0x86   :  { %584 = vmatpush1.bf16.msra.mxu0 %v583_v28 }
  0x87   :  { %586 = vmatprep.subr.bf16.mxu0 %v585_v36 }
  0x8a   :  { %588 = vmatpush1.bf16.msra.mxu0 %v587_v39 }
 0x140   :  { %v170_v30 = vpop.f32.mrb[0].mxu0 }
 0x141   :  { %v171_v31 = vadd.f32 %v403_v29, %v170_v30  ;;  %v473_v32 = vpop.f32.mrb[1].mxu0 }
 0x143   :  { %v174_v33 = vmax.f32 %v171_v31, 0.0 }
 0x145   :  { %507 = vmatmul.mubr.f32.vlgmr.msra.gmra.mrb[0].mxu1 %v174_v33 }
 0x218   :  { %v264_v41 = vpop.f32.mrb[0].mxu1 }
 0x219   :  { %v265_v42 = vadd.f32 %v404_v40, %v264_v41  ;;  %v508_v43 = vpop.f32.mrb[1].mxu1 }
 0x21b   :  { %v268_v44 = vmax.f32 %v265_v42, 0.0 }
 0x21d   :  { %378 = vmatmul.mubr.f32.vlgmr.msra.gmra.mrb[2].mxu0 %v268_v44 }
 0x2f0   :  { %v379_v52 = vpop.f32.mrb[2].mxu0 }
 0x2f1   :  { %v380_v53 = vadd.f32 %v379_v52, %v306_v50  ;;  %v381_v54 = vpop.f32.mrb[3].mxu0 }
 0x2f2   :  { %v382_v55 = vadd.f32 %v381_v54, %v310_v51 }
 0x2f3   :  { %384 = vst [vmem:[#allocation10] sm:$0xff] %v380_v53 }
 0x2f4   :  { %385 = vst [vmem:[#allocation10 + $0x8] sm:$0xff] %v382_v55 }
 0x2f5   :  { %700 = shalt.err (!%p697_p8)
}
 0x2f6   :  { %s701_s10 = scalar_lea.hbm %s872_s7, 256 }
 0x2f7   :  { %p702_p9 = scmp.ne.s32.totalorder %s872_s7, %s701_s10  ;;  %p705_p10 = scmp.lt.u32.totalorder %s701_s10, %s872_s7 }
 0x2f9   :  { %p707_p11 = pnand %p705_p10, %p702_p9 }
 0x2fb   :  { %710 = shalt.err (!%p707_p11)
}
 0x2fc   :  { %395 = dma.vmem_to_hbm [thread:$0]  %s393_s8, 256, %s872_s7, [#allocation4]  }
 0x2fd   :  { %717 = dma.done.wait [#allocation4], 256  }
 0x2fe   :  { %718 = vsyncadd [#allocation4], 4294967040 }
 0x2ff   :  { %399 = vsyncpa [#allocation3], 1 }
 0x300   :  { %400 = vsyncpa [#allocation6], 1 }
 0x301   :  { %401 = vsyncpa [#allocation9], 1 }
 0x302   :  { %402 = vsyncpa [#allocation4], 1 }

</bundles_post_ra>
